<compile_context>
chip_gen: v7x
topology: tpu7x:2x2x1
jax: 0.10.0
libtpu: 0.0.40
codegen_flags: <defaults>
</compile_context>

<pallas_src>
import jax
import jax.numpy as jnp
from jax import lax
from jax.experimental import pallas as pl
from jax.experimental.pallas import tpu as pltpu


def _round_up(x, m):
    return (x + m - 1) // m * m


# ------------------------------- Pallas kernel --------------------------------

def gru_encoder_kernel(tok_ref, emb_ref, h0_ref, w_ref, b_ref, out_ref, lhs_scr):
    """Runs the whole GRU token sequence in one grid step.

    tok_ref : SMEM (S,)          int32 token ids (scalar prefetch)
    emb_ref : VMEM (V, Hp)       zero-padded embedding table (resident)
    h0_ref  : VMEM (1, Hp)       zero-padded initial hidden state
    w_ref   : VMEM (2Hp, 4Hp)    fused weights: rows [x | h], cols [r|z|gi_n|gh_n]
    b_ref   : VMEM (1, 4Hp)      fused bias:    [b_r | b_z | b_in | b_hn]
    out_ref : VMEM (S, Hp)       per-step hidden states (flushed to HBM once)
    lhs_scr : VMEM (1, 2Hp) f32  matmul LHS; lanes [Hp:2Hp] carry the hidden state
    """
    S = out_ref.shape[0]
    Hp = h0_ref.shape[1]

    # Hidden-state carry lives in the second half of the LHS scratch.
    lhs_scr[:, Hp:] = h0_ref[...].astype(jnp.float32)

    def step(t, carry):
        tok = tok_ref[t]
        # In-kernel embedding row gather (table resident in VMEM).
        lhs_scr[:, 0:Hp] = emb_ref[pl.ds(tok, 1), :].astype(jnp.float32)
        h = lhs_scr[:, Hp:]

        # Single fused MXU call per step: [x | h] @ W + b  -> (1, 4Hp).
        g = jnp.dot(lhs_scr[...], w_ref[...],
                    preferred_element_type=jnp.float32) + b_ref[...]

        # torch.nn.GRU gate order: r, z, n ; n = tanh(gi_n + r * gh_n).
        r = jax.nn.sigmoid(g[:, 0 * Hp:1 * Hp])
        z = jax.nn.sigmoid(g[:, 1 * Hp:2 * Hp])
        n = jnp.tanh(g[:, 2 * Hp:3 * Hp] + r * g[:, 3 * Hp:4 * Hp])
        h_new = (1.0 - z) * n + z * h

        lhs_scr[:, Hp:] = h_new                        # carry to next step
        out_ref[pl.ds(t, 1), :] = h_new.astype(out_ref.dtype)
        return carry

    lax.fori_loop(0, S, step, 0)


# ------------------------------ parameter packing ------------------------------

def pack_encoder_params(emb, w_ih, w_hh, b_ih, b_hh):
    """Pack torch.nn.GRU-layout params into the fused, lane-padded kernel layout.

    emb : (V, H) embedding table
    w_ih, w_hh : (3H, H) with gate row order [r; z; n] (PyTorch layout)
    b_ih, b_hh : (3H,)
    Returns (emb_p (V,Hp), W (2Hp,4Hp), b (1,4Hp), H, Hp).
    """
    V, H = emb.shape
    Hp = _round_up(H, 128)

    w_ir, w_iz, w_in = w_ih[0:H], w_ih[H:2 * H], w_ih[2 * H:3 * H]
    w_hr, w_hz, w_hn = w_hh[0:H], w_hh[H:2 * H], w_hh[2 * H:3 * H]
    b_ir, b_iz, b_in = b_ih[0:H], b_ih[H:2 * H], b_ih[2 * H:3 * H]
    b_hr, b_hz, b_hn = b_hh[0:H], b_hh[H:2 * H], b_hh[2 * H:3 * H]

    W = jnp.zeros((2 * Hp, 4 * Hp), jnp.float32)
    # rows 0:H -> x ; rows Hp:Hp+H -> h ; padded rows/cols stay zero.
    W = W.at[0:H,       0 * Hp:0 * Hp + H].set(w_ir.T)   # r from x
    W = W.at[Hp:Hp + H, 0 * Hp:0 * Hp + H].set(w_hr.T)   # r from h
    W = W.at[0:H,       1 * Hp:1 * Hp + H].set(w_iz.T)   # z from x
    W = W.at[Hp:Hp + H, 1 * Hp:1 * Hp + H].set(w_hz.T)   # z from h
    W = W.at[0:H,       2 * Hp:2 * Hp + H].set(w_in.T)   # gi_n (x only)
    W = W.at[Hp:Hp + H, 3 * Hp:3 * Hp + H].set(w_hn.T)   # gh_n (h only)

    b = jnp.zeros((1, 4 * Hp), jnp.float32)
    b = b.at[0, 0 * Hp:0 * Hp + H].set(b_ir + b_hr)
    b = b.at[0, 1 * Hp:1 * Hp + H].set(b_iz + b_hz)
    b = b.at[0, 2 * Hp:2 * Hp + H].set(b_in)
    b = b.at[0, 3 * Hp:3 * Hp + H].set(b_hn)

    emb_p = jnp.zeros((V, Hp), jnp.float32).at[:, :H].set(emb.astype(jnp.float32))
    return emb_p, W, b, H, Hp


# ---------------------------------- wrappers -----------------------------------

def encoder_forward_sequence(tokens, hidden0, emb_p, W_fused, b_fused, H):
    """Run the GRU over a whole token sequence in ONE pallas_call / ONE grid step.

    tokens : (S,) int32 ; hidden0 : (1, 1, H)
    Returns (outputs (S,1,H), hidden (1,1,H)) like nn.GRU.
    """
    S = tokens.shape[0]
    V, Hp = emb_p.shape
    h0 = jnp.zeros((1, Hp), jnp.float32).at[:, :H].set(
        hidden0.reshape(1, H).astype(jnp.float32))

    grid_spec = pltpu.PrefetchScalarGridSpec(
        num_scalar_prefetch=1,              # token ids -> SMEM
        grid=(1,),                          # single step; time loop is in-kernel
        in_specs=[
            pl.BlockSpec((V, Hp), lambda i, tok: (0, 0)),           # embedding
            pl.BlockSpec((1, Hp), lambda i, tok: (0, 0)),           # h0
            pl.BlockSpec((2 * Hp, 4 * Hp), lambda i, tok: (0, 0)),  # fused W
            pl.BlockSpec((1, 4 * Hp), lambda i, tok: (0, 0)),       # fused b
        ],
        out_specs=pl.BlockSpec((S, Hp), lambda i, tok: (0, 0)),
        scratch_shapes=[pltpu.VMEM((1, 2 * Hp), jnp.float32)],
    )

    out_padded = pl.pallas_call(
        gru_encoder_kernel,
        grid_spec=grid_spec,
        out_shape=jax.ShapeDtypeStruct((S, Hp), jnp.float32),
        compiler_params=pltpu.CompilerParams(
            dimension_semantics=("arbitrary",)),
    )(tokens, emb_p, h0, W_fused, b_fused)

    outputs = out_padded[:, :H].reshape(S, 1, H)
    hidden = outputs[S - 1].reshape(1, 1, H)     # single layer: last output == hidden
    return outputs, hidden


def encoder_forward(token_idx, hidden, emb_p, W_fused, b_fused, H):
    """Exact semantics of Encoder.forward: one token (1,), hidden (1, 1, H)."""
    return encoder_forward_sequence(token_idx, hidden, emb_p, W_fused, b_fused, H)


# ----------------------------- pure-JAX reference ------------------------------

def encoder_reference_sequence(tokens, hidden0, emb, w_ih, w_hh, b_ih, b_hh):
    H = emb.shape[1]
    h = hidden0.reshape(1, H).astype(jnp.float32)
    outs = []
    for t in range(tokens.shape[0]):
        x = emb[tokens[t]][None, :].astype(jnp.float32)
        gi = x @ w_ih.T + b_ih
        gh = h @ w_hh.T + b_hh
        r = jax.nn.sigmoid(gi[:, 0:H] + gh[:, 0:H])
        z = jax.nn.sigmoid(gi[:, H:2 * H] + gh[:, H:2 * H])
        n = jnp.tanh(gi[:, 2 * H:3 * H] + r * gh[:, 2 * H:3 * H])
        h = (1.0 - z) * n + z * h
        outs.append(h)
    return jnp.stack(outs, axis=0), h.reshape(1, 1, H)


# ------------------------------------ main --------------------------------------

if __name__ == "__main__":
    input_size = 16     # vocab size
    hidden_size = 32
    H = hidden_size

    key = jax.random.PRNGKey(0)
    k_emb, k_wih, k_whh, k_bih, k_bhh, k_tok = jax.random.split(key, 6)

    # nn.Embedding ~ N(0, 1); nn.GRU params ~ U(-1/sqrt(H), 1/sqrt(H)),
    # PyTorch layout: weight_ih/hh (3H, H) with gate row order [r; z; n].
    bound = 1.0 / jnp.sqrt(hidden_size)
    emb = jax.random.normal(k_emb, (input_size, H), dtype=jnp.float32)
    w_ih = jax.random.uniform(k_wih, (3 * H, H), minval=-bound, maxval=bound,
                              dtype=jnp.float32)
    w_hh = jax.random.uniform(k_whh, (3 * H, H), minval=-bound, maxval=bound,
                              dtype=jnp.float32)
    b_ih = jax.random.uniform(k_bih, (3 * H,), minval=-bound, maxval=bound,
                              dtype=jnp.float32)
    b_hh = jax.random.uniform(k_bhh, (3 * H,), minval=-bound, maxval=bound,
                              dtype=jnp.float32)

    emb_p, W_fused, b_fused, H, Hp = pack_encoder_params(emb, w_ih, w_hh, b_ih, b_hh)

    hidden0 = jnp.zeros((1, 1, H), dtype=jnp.float32)   # Encoder.InitHidden()

    # --- single-step forward (the module's forward) ---
    token = jnp.array([3], dtype=jnp.int32)
    out1, hid1 = encoder_forward(token, hidden0, emb_p, W_fused, b_fused, H)
    out1 = jax.block_until_ready(out1)
    hid1 = jax.block_until_ready(hid1)
    out1_ref, hid1_ref = encoder_reference_sequence(
        token, hidden0, emb, w_ih, w_hh, b_ih, b_hh)
    assert out1.shape == (1, 1, H) and hid1.shape == (1, 1, H)
    assert jnp.allclose(out1, out1_ref, rtol=1e-5, atol=2e-5)
    assert jnp.allclose(hid1, hid1_ref, rtol=1e-5, atol=2e-5)

    # --- whole-sequence forward (single grid step, in-kernel time loop) ---
    seq_len = 6
    tokens = jax.random.randint(k_tok, (seq_len,), 0, input_size, dtype=jnp.int32)
    outs, hid = encoder_forward_sequence(
        tokens, hidden0, emb_p, W_fused, b_fused, H)
    outs = jax.block_until_ready(outs)
    hid = jax.block_until_ready(hid)
    outs_ref, hid_ref = encoder_reference_sequence(
        tokens, hidden0, emb, w_ih, w_hh, b_ih, b_hh)
    assert outs.shape == (seq_len, 1, H) and hid.shape == (1, 1, H)
    assert jnp.allclose(outs, outs_ref, rtol=1e-5, atol=2e-5)
    assert jnp.allclose(hid, hid_ref, rtol=1e-5, atol=2e-5)

    print("KERNEL_OK")
</pallas_src>

<mosaic_0001>
module attributes {stable_mosaic.version = 11 : i64} {
  func.func @gru_encoder_kernel(%arg0: i32, %arg1: memref<1xi32, #tpu.memory_space<smem>>, %arg2: memref<16x128xf32, #tpu.memory_space<vmem>>, %arg3: memref<1x128xf32, #tpu.memory_space<vmem>>, %arg4: memref<256x512xf32, #tpu.memory_space<vmem>>, %arg5: memref<1x512xf32, #tpu.memory_space<vmem>>, %arg6: memref<1x128xf32, #tpu.memory_space<vmem>>, %arg7: memref<1x256xf32, #tpu.memory_space<vmem>>) attributes {dimension_semantics = [#tpu.dimension_semantics<arbitrary>], iteration_bounds = array<i64: 1>, scalar_prefetch = 1 : i64, scratch_operands = 1 : i64, tpu.core_type = #tpu.core_type<tc>, window_params = [{pipeline_mode = #tpu.pipeline_mode<synchronous>, transform_indices = @transform_0, window_bounds = array<i64: 16, 128>}, {pipeline_mode = #tpu.pipeline_mode<synchronous>, transform_indices = @transform_1, window_bounds = array<i64: 1, 128>}, {pipeline_mode = #tpu.pipeline_mode<synchronous>, transform_indices = @transform_2, window_bounds = array<i64: 256, 512>}, {pipeline_mode = #tpu.pipeline_mode<synchronous>, transform_indices = @transform_3, window_bounds = array<i64: 1, 512>}, {pipeline_mode = #tpu.pipeline_mode<synchronous>, transform_indices = @transform_4, window_bounds = array<i64: 1, 128>}]} {
    %c0 = arith.constant 0 : index
    %c0_0 = arith.constant 0 : index
    %0 = vector.load %arg3[%c0, %c0_0] : memref<1x128xf32, #tpu.memory_space<vmem>>, vector<1x128xf32>
    %c0_1 = arith.constant 0 : index
    %c128 = arith.constant 128 : index
    %1 = vector.load %arg7[%c0_1, %c128] : memref<1x256xf32, #tpu.memory_space<vmem>>, vector<1x128xf32>
    tpu.vector_store %arg7[%c0_1, %c128], %0 {strides = array<i32>} : memref<1x256xf32, #tpu.memory_space<vmem>>, vector<1x128xf32>,
    %c0_i32 = arith.constant 0 : i32
    %2 = arith.index_cast %c0_i32 : i32 to index
    %3 = memref.load %arg1[%2] : memref<1xi32, #tpu.memory_space<smem>>
    %4 = arith.index_cast %3 : i32 to index
    %c0_2 = arith.constant 0 : index
    %5 = vector.load %arg2[%4, %c0_2] : memref<16x128xf32, #tpu.memory_space<vmem>>, vector<1x128xf32>
    %c0_3 = arith.constant 0 : index
    %c0_4 = arith.constant 0 : index
    %6 = vector.load %arg7[%c0_3, %c0_4] : memref<1x256xf32, #tpu.memory_space<vmem>>, vector<1x128xf32>
    tpu.vector_store %arg7[%c0_3, %c0_4], %5 {strides = array<i32>} : memref<1x256xf32, #tpu.memory_space<vmem>>, vector<1x128xf32>,
    %c0_5 = arith.constant 0 : index
    %c128_6 = arith.constant 128 : index
    %7 = vector.load %arg7[%c0_5, %c128_6] : memref<1x256xf32, #tpu.memory_space<vmem>>, vector<1x128xf32>
    %c0_7 = arith.constant 0 : index
    %c0_8 = arith.constant 0 : index
    %8 = vector.load %arg7[%c0_7, %c0_8] : memref<1x256xf32, #tpu.memory_space<vmem>>, vector<1x256xf32>
    %c0_9 = arith.constant 0 : index
    %c0_10 = arith.constant 0 : index
    %9 = vector.load %arg4[%c0_9, %c0_10] : memref<256x512xf32, #tpu.memory_space<vmem>>, vector<256x512xf32>
    %cst = arith.constant dense<0.000000e+00> : vector<1x512xf32>
    %10 = tpu.matmul %8, %9, %cst {dimension_numbers = #tpu.dot_dimension_numbers<[1], [0], [0], [1], [0, 0, 1, 1], [], []>} : vector<1x256xf32>, vector<256x512xf32>, vector<1x512xf32> -> vector<1x512xf32>
    %c0_11 = arith.constant 0 : index
    %c0_12 = arith.constant 0 : index
    %11 = vector.load %arg5[%c0_11, %c0_12] : memref<1x512xf32, #tpu.memory_space<vmem>>, vector<1x512xf32>
    %12 = arith.addf %10, %11 : vector<1x512xf32>
    %13 = vector.extract_strided_slice %12 {offsets = [0, 0], sizes = [1, 128], strides = [1, 1]} : vector<1x512xf32> to vector<1x128xf32>
    %14 = arith.negf %13 : vector<1x128xf32>
    %15 = math.exp %14 : vector<1x128xf32>
    %cst_13 = arith.constant 1.000000e+00 : f32
    %16 = vector.broadcast %cst_13 : f32 to vector<1x128xf32>
    %17 = arith.addf %16, %15 : vector<1x128xf32>
    %18 = arith.divf %16, %17 : vector<1x128xf32>
    %19 = vector.extract_strided_slice %12 {offsets = [0, 128], sizes = [1, 128], strides = [1, 1]} : vector<1x512xf32> to vector<1x128xf32>
    %20 = arith.negf %19 : vector<1x128xf32>
    %21 = math.exp %20 : vector<1x128xf32>
    %cst_14 = arith.constant 1.000000e+00 : f32
    %22 = vector.broadcast %cst_14 : f32 to vector<1x128xf32>
    %23 = arith.addf %22, %21 : vector<1x128xf32>
    %24 = arith.divf %22, %23 : vector<1x128xf32>
    %25 = vector.extract_strided_slice %12 {offsets = [0, 256], sizes = [1, 128], strides = [1, 1]} : vector<1x512xf32> to vector<1x128xf32>
    %26 = vector.extract_strided_slice %12 {offsets = [0, 384], sizes = [1, 128], strides = [1, 1]} : vector<1x512xf32> to vector<1x128xf32>
    %27 = arith.mulf %18, %26 : vector<1x128xf32>
    %28 = arith.addf %25, %27 : vector<1x128xf32>
    %29 = math.tanh %28 : vector<1x128xf32>
    %cst_15 = arith.constant 1.000000e+00 : f32
    %30 = vector.broadcast %cst_15 : f32 to vector<1x128xf32>
    %31 = arith.subf %30, %24 : vector<1x128xf32>
    %32 = arith.mulf %31, %29 : vector<1x128xf32>
    %33 = arith.mulf %24, %7 : vector<1x128xf32>
    %34 = arith.addf %32, %33 : vector<1x128xf32>
    %c0_16 = arith.constant 0 : index
    %c128_17 = arith.constant 128 : index
    %35 = vector.load %arg7[%c0_16, %c128_17] : memref<1x256xf32, #tpu.memory_space<vmem>>, vector<1x128xf32>
    tpu.vector_store %arg7[%c0_16, %c128_17], %34 {strides = array<i32>} : memref<1x256xf32, #tpu.memory_space<vmem>>, vector<1x128xf32>,
    %36 = arith.index_cast %c0_i32 : i32 to index
    %c0_18 = arith.constant 0 : index
    %37 = vector.load %arg6[%36, %c0_18] : memref<1x128xf32, #tpu.memory_space<vmem>>, vector<1x128xf32>
    tpu.vector_store %arg6[%36, %c0_18], %34 {strides = array<i32>} : memref<1x128xf32, #tpu.memory_space<vmem>>, vector<1x128xf32>,
    %c1_i32 = arith.constant 1 : i32
    return
  }
  func.func @transform_0(%arg0: i32, %arg1: memref<1xi32, #tpu.memory_space<smem>>) -> (i32, i32) {
    %c0_i32 = arith.constant 0 : i32
    %c0_i32_0 = arith.constant 0 : i32
    %c0_i32_1 = arith.constant 0 : i32
    return %c0_i32, %c0_i32_0 : i32, i32
  }
  func.func @transform_1(%arg0: i32, %arg1: memref<1xi32, #tpu.memory_space<smem>>) -> (i32, i32) {
    %c0_i32 = arith.constant 0 : i32
    %c0_i32_0 = arith.constant 0 : i32
    %c0_i32_1 = arith.constant 0 : i32
    return %c0_i32, %c0_i32_0 : i32, i32
  }
  func.func @transform_2(%arg0: i32, %arg1: memref<1xi32, #tpu.memory_space<smem>>) -> (i32, i32) {
    %c0_i32 = arith.constant 0 : i32
    %c0_i32_0 = arith.constant 0 : i32
    %c0_i32_1 = arith.constant 0 : i32
    return %c0_i32, %c0_i32_0 : i32, i32
  }
  func.func @transform_3(%arg0: i32, %arg1: memref<1xi32, #tpu.memory_space<smem>>) -> (i32, i32) {
    %c0_i32 = arith.constant 0 : i32
    %c0_i32_0 = arith.constant 0 : i32
    %c0_i32_1 = arith.constant 0 : i32
    return %c0_i32, %c0_i32_0 : i32, i32
  }
  func.func @transform_4(%arg0: i32, %arg1: memref<1xi32, #tpu.memory_space<smem>>) -> (i32, i32) {
    %c0_i32 = arith.constant 0 : i32
    %c0_i32_0 = arith.constant 0 : i32
    %c0_i32_1 = arith.constant 0 : i32
    return %c0_i32, %c0_i32_0 : i32, i32
  }
}

</mosaic_0001>

<bundles_post_ra>
// kernel: tpu_custom_call.1
= control target key start
LH: loop header
LB: loop body
LE: loop exit
PB: predicated region body
PF: predicated region fallthrough
CT: control target
= control target key end

     0   :  { %11 = vsyncpa [#allocation6], 0  ;;  %s726_s0 = inlined_call_operand.<no memory space> [shape: s32[1], index: 0, kind: input, shape index: {}]   ;;  %s727_s1 = inlined_call_operand.hbm [shape: f32[16,128], index: 1, kind: input, shape index: {}]   ;;  %s728_s2 = inlined_call_operand.vmem [shape: f32[1,128], index: 2, kind: input, shape index: {}]   ;;  %s729_s3 = inlined_call_operand.hbm [shape: f32[256,512], index: 3, kind: input, shape index: {}]   ;;  %s730_s4 = inlined_call_operand.vmem [shape: f32[1,512], index: 4, kind: input, shape index: {}]   ;;  %s731_s5 = inlined_call_operand.hbm [shape: f32[1,128], index: 5, kind: output, shape index: {}]  }
   0x1   :  { %12 = vsyncpa [#allocation9], 0 }
   0x2   :  { %13 = vsyncpa [#allocation7], 0  ;;  %s620_s18 = smov [#allocation5]   ;;  %s548_s22 = scalar_lea.hbm %s727_s1, 256 }
   0x3   :  { %s19_s19 = sshll.u32 %s620_s18, 4  ;;  %p549_p0 = scmp.ne.s32.totalorder %s727_s1, %s548_s22  ;;  %s20_s19 = int_to_ptr.vmem [resolvable:$true] %s19_s19 }
   0x4   :  { %p552_p1 = scmp.lt.u32.totalorder %s548_s22, %s727_s1 }
   0x6   :  { %p554_p2 = pnand %p552_p1, %p549_p0 }
   0x8   :  { %557 = shalt.err (!%p554_p2)
}
   0x9   :  { %s558_s27 = scalar_lea.vmem %s20_s19, 256  ;;  %p563_p4 = scmp.lt.s32.totalorder %s20_s19, %s20_s19 }
   0xa   :  { %p559_p3 = scmp.ne.s32.totalorder %s20_s19, %s558_s27  ;;  %p564_p5 = scmp.lt.s32.totalorder %s558_s27, %s558_s27 }
   0xc   :  { %p565_p6 = por %p564_p5, %p563_p4 }
   0xe   :  { %p566_p7 = pnand %p565_p6, %p559_p3 }
  0x10   :  { %569 = shalt.err (!%p566_p7)
}
  0x11   :  { %s621_s28 = smov 128   ;;  %s622_s29 = smov 8  }
  0x12   :  { %25 = dma.hbm_to_vmem [thread:$0]  %s727_s1, 256, %s20_s19, [#allocation6], %s621_s28, %s621_s28, %s622_s29  }
  0x13   :  { %s623_s7 = smov [#allocation8]   ;;  %s570_s11 = scalar_lea.hbm %s729_s3, 16384 }
  0x14   :  { %s33_s8 = sshll.u32 %s623_s7, 4  ;;  %p571_p8 = scmp.ne.s32.totalorder %s729_s3, %s570_s11  ;;  %s34_s8 = int_to_ptr.vmem [resolvable:$true] %s33_s8 }
  0x15   :  { %p574_p9 = scmp.lt.u32.totalorder %s570_s11, %s729_s3 }
  0x17   :  { %p576_p10 = pnand %p574_p9, %p571_p8 }
  0x19   :  { %579 = shalt.err (!%p576_p10)
}
  0x1a   :  { %s580_s16 = scalar_lea.vmem %s34_s8, 16384  ;;  %p585_p12 = scmp.lt.s32.totalorder %s34_s8, %s34_s8 }
  0x1b   :  { %p581_p11 = scmp.ne.s32.totalorder %s34_s8, %s580_s16  ;;  %p586_p13 = scmp.lt.s32.totalorder %s580_s16, %s580_s16 }
  0x1d   :  { %p587_p0 = por %p586_p13, %p585_p12 }
  0x1f   :  { %p588_p1 = pnand %p587_p0, %p581_p11 }
  0x21   :  { %591 = shalt.err (!%p588_p1)
}
  0x22   :  { %s624_s1 = smov 512   ;;  %s625_s17 = smov 32  }
  0x23   :  { %39 = dma.hbm_to_vmem [thread:$0]  %s729_s3, 16384, %s34_s8, [#allocation9], %s624_s1, %s624_s1, %s625_s17  }
  0x24   :  { %614 = dma.done.wait [#allocation6], 256  }
  0x25   :  { %615 = vsyncadd [#allocation6], 4294967040 }
  0x26   :  { %616 = dma.done.wait [#allocation9], 16384  }
  0x27   :  { %617 = vsyncadd [#allocation9], 4294950912  ;;  %v61_v0 = vld [vmem:[#allocation8 + $0x8] sm:$0xff]  ;;  %v60_v2 = vld [vmem:[#allocation8] sm:$0xff]  ;;  %s55_s23 = scalar_lea.vmem [#allocation5], %s726_s0 }
  0x28   :  { %v65_v1 = vld [vmem:[#allocation8 + $0x28] sm:$0xff]  ;;  %v64_v4 = vld [vmem:[#allocation8 + $0x20] sm:$0xff]  ;;  %v63_v21 = vld [vmem:[#allocation8 + $0x18] sm:$0xff] }
  0x29   :  { %v403_v3 = vpack.c.bf16 %v65_v1, %v61_v0  ;;  %v69_v5 = vld [vmem:[#allocation8 + $0x48] sm:$0xff]  ;;  %v405_v7 = vpack.c.bf16 %v64_v4, %v60_v2  ;;  %v68_v9 = vld [vmem:[#allocation8 + $0x40] sm:$0xff]  ;;  %v67_v25 = vld [vmem:[#allocation8 + $0x38] sm:$0xff] }
  0x2a   :  { %v73_v6 = vld [vmem:[#allocation8 + $0x68] sm:$0xff]  ;;  %v72_v10 = vld [vmem:[#allocation8 + $0x60] sm:$0xff]  ;;  %v467_v27 = vpack.c.bf16 %v67_v25, %v63_v21  ;;  %v62_v28 = vld [vmem:[#allocation8 + $0x10] sm:$0xff] }
  0x2b   :  { %v407_v8 = vpack.c.bf16 %v73_v6, %v69_v5  ;;  %v77_v11 = vld [vmem:[#allocation8 + $0x88] sm:$0xff]  ;;  %404 = vmatprep.subr.bf16.mxu0 %v403_v3  ;;  %v409_v13 = vpack.c.bf16 %v72_v10, %v68_v9  ;;  %v76_v15 = vld [vmem:[#allocation8 + $0x80] sm:$0xff]  ;;  %v66_v29 = vld [vmem:[#allocation8 + $0x30] sm:$0xff] }
  0x2c   :  { %v81_v12 = vld [vmem:[#allocation8 + $0xa8] sm:$0xff]  ;;  %406 = vmatpush1.bf16.msra.mxu0 %v405_v7  ;;  %v80_v16 = vld [vmem:[#allocation8 + $0xa0] sm:$0xff]  ;;  %v469_v30 = vpack.c.bf16 %v66_v29, %v62_v28  ;;  %v71_v31 = vld [vmem:[#allocation8 + $0x58] sm:$0xff]  ;;  %468 = vmatprep.subr.bf16.mxu1 %v467_v27 }
  0x2d   :  { %408 = vmatprep.subr.bf16.mxu0 %v407_v8  ;;  %v411_v14 = vpack.c.bf16 %v81_v12, %v77_v11  ;;  %v85_v17 = vld [vmem:[#allocation8 + $0xc8] sm:$0xff]  ;;  %v413_v19 = vpack.c.bf16 %v80_v16, %v76_v15  ;;  %v84_v20 = vld [vmem:[#allocation8 + $0xc0] sm:$0xff]  ;;  %v75_v32 = vld [vmem:[#allocation8 + $0x78] sm:$0xff] }
  0x2e   :  { %v89_v18 = vld [vmem:[#allocation8 + $0xe8] sm:$0xff]  ;;  %v88_v23 = vld [vmem:[#allocation8 + $0xe0] sm:$0xff]  ;;  %v471_v35 = vpack.c.bf16 %v75_v32, %v71_v31  ;;  %v70_v36 = vld [vmem:[#allocation8 + $0x50] sm:$0xff]  ;;  %470 = vmatpush1.bf16.msra.mxu1 %v469_v30 }
  0x2f   :  { %v415_v22 = vpack.c.bf16 %v89_v18, %v85_v17  ;;  %v93_v24 = vld [vmem:[#allocation8 + $0x108] sm:$0xff]  ;;  %v417_v33 = vpack.c.bf16 %v88_v23, %v84_v20  ;;  %v92_v34 = vld [vmem:[#allocation8 + $0x100] sm:$0xff]  ;;  %v74_v40 = vld [vmem:[#allocation8 + $0x70] sm:$0xff]  ;;  %v49_v23 = vlaneseq }
  0x30   :  { %410 = vmatpush1.bf16.msra.mxu0 %v409_v13  ;;  %v97_v26 = vld [vmem:[#allocation8 + $0x128] sm:$0xff]  ;;  %v96_v38 = vld [vmem:[#allocation8 + $0x120] sm:$0xff]  ;;  %472 = vmatprep.subr.bf16.mxu1 %v471_v35  ;;  %v473_v42 = vpack.c.bf16 %v74_v40, %v70_v36  ;;  %v79_v43 = vld [vmem:[#allocation8 + $0x98] sm:$0xff] }
  0x31   :  { %412 = vmatprep.subr.bf16.mxu0 %v411_v14  ;;  %v419_v37 = vpack.c.bf16 %v97_v26, %v93_v24  ;;  %v101_v39 = vld [vmem:[#allocation8 + $0x148] sm:$0xff]  ;;  %v83_v44 = vld [vmem:[#allocation8 + $0xb8] sm:$0xff]  ;;  %v78_v46 = vld [vmem:[#allocation8 + $0x90] sm:$0xff]  ;;  %v421_v48 = vpack.c.bf16 %v96_v38, %v92_v34  ;;  %vm681_vm0 = vcmp.lt.s32.totalorder %v49_v23, 128 }
  0x32   :  { %v105_v41 = vld [vmem:[#allocation8 + $0x168] sm:$0xff]  ;;  %v475_v45 = vpack.c.bf16 %v83_v44, %v79_v43  ;;  %v82_v47 = vld [vmem:[#allocation8 + $0xb0] sm:$0xff]  ;;  %v100_v49 = vld [vmem:[#allocation8 + $0x140] sm:$0xff]  ;;  %474 = vmatpush1.bf16.msra.mxu1 %v473_v42 }
  0x33   :  { %v87_v50 = vld [vmem:[#allocation8 + $0xd8] sm:$0xff]  ;;  %v423_v51 = vpack.c.bf16 %v105_v41, %v101_v39  ;;  %v104_v52 = vld [vmem:[#allocation8 + $0x160] sm:$0xff]  ;;  %v109_v53 = vld [vmem:[#allocation8 + $0x188] sm:$0xff]  ;;  %v477_v54 = vpack.c.bf16 %v82_v47, %v78_v46 }
  0x34   :  { %414 = vmatpush1.bf16.msra.mxu0 %v413_v19  ;;  %v91_v55 = vld [vmem:[#allocation8 + $0xf8] sm:$0xff]  ;;  %v113_v56 = vld [vmem:[#allocation8 + $0x1a8] sm:$0xff]  ;;  %476 = vmatprep.subr.bf16.mxu1 %v475_v45  ;;  %v86_v58 = vld [vmem:[#allocation8 + $0xd0] sm:$0xff]  ;;  %v425_v62 = vpack.c.bf16 %v104_v52, %v100_v49 }
  0x35   :  { %416 = vmatprep.subr.bf16.mxu0 %v415_v22  ;;  %v479_v57 = vpack.c.bf16 %v91_v55, %v87_v50  ;;  %v90_v59 = vld [vmem:[#allocation8 + $0xf0] sm:$0xff]  ;;  %v95_v60 = vld [vmem:[#allocation8 + $0x118] sm:$0xff]  ;;  %v427_v63 = vpack.c.bf16 %v113_v56, %v109_v53  ;;  %v108_v0 = vld [vmem:[#allocation8 + $0x180] sm:$0xff] }
  0x36   :  { %v99_v61 = vld [vmem:[#allocation8 + $0x138] sm:$0xff]  ;;  %v112_v1 = vld [vmem:[#allocation8 + $0x1a0] sm:$0xff]  ;;  %v117_v2 = vld [vmem:[#allocation8 + $0x1c8] sm:$0xff]  ;;  %478 = vmatpush1.bf16.msra.mxu1 %v477_v54  ;;  %v481_v3 = vpack.c.bf16 %v90_v59, %v86_v58 }
  0x37   :  { %v121_v4 = vld [vmem:[#allocation8 + $0x1e8] sm:$0xff]  ;;  %480 = vmatprep.subr.bf16.mxu1 %v479_v57  ;;  %v483_v5 = vpack.c.bf16 %v99_v61, %v95_v60  ;;  %v94_v6 = vld [vmem:[#allocation8 + $0x110] sm:$0xff]  ;;  %v103_v8 = vld [vmem:[#allocation8 + $0x158] sm:$0xff]  ;;  %v429_v10 = vpack.c.bf16 %v112_v1, %v108_v0 }
  0x38   :  { %418 = vmatpush1.bf16.msra.mxu0 %v417_v33  ;;  %v98_v7 = vld [vmem:[#allocation8 + $0x130] sm:$0xff]  ;;  %v107_v9 = vld [vmem:[#allocation8 + $0x178] sm:$0xff]  ;;  %v431_v11 = vpack.c.bf16 %v121_v4, %v117_v2  ;;  %v116_v12 = vld [vmem:[#allocation8 + $0x1c0] sm:$0xff] }
  0x39   :  { %420 = vmatprep.subr.bf16.mxu0 %v419_v37  ;;  %v120_v13 = vld [vmem:[#allocation8 + $0x1e0] sm:$0xff]  ;;  %v125_v14 = vld [vmem:[#allocation8 + $0x208] sm:$0xff]  ;;  %v485_v15 = vpack.c.bf16 %v98_v7, %v94_v6  ;;  %v487_v17 = vpack.c.bf16 %v107_v9, %v103_v8  ;;  %v102_v18 = vld [vmem:[#allocation8 + $0x150] sm:$0xff] }
  0x3a   :  { %482 = vmatpush1.bf16.msra.mxu1 %v481_v3  ;;  %v129_v16 = vld [vmem:[#allocation8 + $0x228] sm:$0xff]  ;;  %v106_v19 = vld [vmem:[#allocation8 + $0x170] sm:$0xff]  ;;  %v111_v20 = vld [vmem:[#allocation8 + $0x198] sm:$0xff]  ;;  %v433_v22 = vpack.c.bf16 %v120_v13, %v116_v12 }
  0x3b   :  { %484 = vmatprep.subr.bf16.mxu1 %v483_v5  ;;  %v115_v21 = vld [vmem:[#allocation8 + $0x1b8] sm:$0xff]  ;;  %v435_v24 = vpack.c.bf16 %v129_v16, %v125_v14  ;;  %v124_v25 = vld [vmem:[#allocation8 + $0x200] sm:$0xff]  ;;  %v133_v27 = vld [vmem:[#allocation8 + $0x248] sm:$0xff]  ;;  %v489_v28 = vpack.c.bf16 %v106_v19, %v102_v18 }
  0x3c   :  { %422 = vmatpush1.bf16.msra.mxu0 %v421_v48  ;;  %v128_v26 = vld [vmem:[#allocation8 + $0x220] sm:$0xff]  ;;  %v137_v29 = vld [vmem:[#allocation8 + $0x268] sm:$0xff]  ;;  %v491_v30 = vpack.c.bf16 %v115_v21, %v111_v20  ;;  %v110_v31 = vld [vmem:[#allocation8 + $0x190] sm:$0xff] }
  0x3d   :  { %424 = vmatprep.subr.bf16.mxu0 %v423_v51  ;;  %v114_v32 = vld [vmem:[#allocation8 + $0x1b0] sm:$0xff]  ;;  %v119_v33 = vld [vmem:[#allocation8 + $0x1d8] sm:$0xff]  ;;  %v437_v35 = vpack.c.bf16 %v128_v26, %v124_v25  ;;  %v132_v36 = vld [vmem:[#allocation8 + $0x240] sm:$0xff]  ;;  %v439_v38 = vpack.c.bf16 %v137_v29, %v133_v27  ;;  %v695_v51 = vshrl.u32 %v49_v23, 7 }
  0x3e   :  { %486 = vmatpush1.bf16.msra.mxu1 %v485_v15  ;;  %v123_v34 = vld [vmem:[#allocation8 + $0x1f8] sm:$0xff]  ;;  %v136_v39 = vld [vmem:[#allocation8 + $0x260] sm:$0xff]  ;;  %v141_v40 = vld [vmem:[#allocation8 + $0x288] sm:$0xff]  ;;  %v493_v42 = vpack.c.bf16 %v114_v32, %v110_v31 }
  0x3f   :  { %488 = vmatprep.subr.bf16.mxu1 %v487_v17  ;;  %v145_v41 = vld [vmem:[#allocation8 + $0x2a8] sm:$0xff]  ;;  %v495_v43 = vpack.c.bf16 %v123_v34, %v119_v33  ;;  %v118_v44 = vld [vmem:[#allocation8 + $0x1d0] sm:$0xff]  ;;  %v127_v47 = vld [vmem:[#allocation8 + $0x218] sm:$0xff]  ;;  %v441_v50 = vpack.c.bf16 %v136_v39, %v132_v36  ;;  %v196_v0 = vsub.s32 1, %v695_v51 }
  0x40   :  { %426 = vmatpush1.bf16.msra.mxu0 %v425_v62  ;;  %v122_v45 = vld [vmem:[#allocation8 + $0x1f0] sm:$0xff]  ;;  %v48_v46 = vld [vmem:[%s728_s2] sm:$0x1]  ;;  %v131_v48 = vld [vmem:[#allocation8 + $0x238] sm:$0xff]  ;;  %v443_v52 = vpack.c.bf16 %v145_v41, %v141_v40 }
  0x41   :  { %428 = vmatprep.subr.bf16.mxu0 %v427_v63  ;;  %53 = vst.msk [vmem:[#allocation2 + $0x1] sm:$0x1] %vm681_vm0, %v48_v46  ;;  %v56_v49 = vld [vmem:[%s55_s23] sm:$0x1]  ;;  %v140_v53 = vld [vmem:[#allocation8 + $0x280] sm:$0xff]  ;;  %v497_v56 = vpack.c.bf16 %v122_v45, %v118_v44  ;;  %v499_v58 = vpack.c.bf16 %v131_v48, %v127_v47  ;;  %v126_v59 = vld [vmem:[#allocation8 + $0x210] sm:$0xff] }
  0x42   :  { %490 = vmatpush1.bf16.msra.mxu1 %v489_v28  ;;  %57 = vst.msk [vmem:[#allocation2] sm:$0x1] %vm681_vm0, %v56_v49  ;;  %v144_v54 = vld [vmem:[#allocation8 + $0x2a0] sm:$0xff]  ;;  %v149_v55 = vld [vmem:[#allocation8 + $0x2c8] sm:$0xff]  ;;  %v130_v60 = vld [vmem:[#allocation8 + $0x230] sm:$0xff] }
  0x43   :  { %492 = vmatprep.subr.bf16.mxu1 %v491_v30  ;;  %v153_v57 = vld [vmem:[#allocation8 + $0x2e8] sm:$0xff]  ;;  %v135_v61 = vld [vmem:[#allocation8 + $0x258] sm:$0xff]  ;;  %v445_v63 = vpack.c.bf16 %v144_v54, %v140_v53  ;;  %v148_v2 = vld [vmem:[#allocation8 + $0x2c0] sm:$0xff]  ;;  %v501_v5 = vpack.c.bf16 %v130_v60, %v126_v59  ;;  %v192_v60 = vsub.s32 0, %v695_v51 }
  0x44   :  { %430 = vmatpush1.bf16.msra.mxu0 %v429_v10  ;;  %v139_v62 = vld [vmem:[#allocation8 + $0x278] sm:$0xff]  ;;  %v447_v1 = vpack.c.bf16 %v153_v57, %v149_v55  ;;  %v152_v3 = vld [vmem:[#allocation8 + $0x2e0] sm:$0xff]  ;;  %v157_v4 = vld [vmem:[#allocation8 + $0x308] sm:$0xff] }
  0x45   :  { %432 = vmatprep.subr.bf16.mxu0 %v431_v11  ;;  %v161_v6 = vld [vmem:[#allocation8 + $0x328] sm:$0xff]  ;;  %v503_v7 = vpack.c.bf16 %v139_v62, %v135_v61  ;;  %v134_v8 = vld [vmem:[#allocation8 + $0x250] sm:$0xff]  ;;  %v143_v11 = vld [vmem:[#allocation8 + $0x298] sm:$0xff]  ;;  %v449_v13 = vpack.c.bf16 %v152_v3, %v148_v2 }
  0x46   :  { %494 = vmatpush1.bf16.msra.mxu1 %v493_v42  ;;  %v138_v9 = vld [vmem:[#allocation8 + $0x270] sm:$0xff]  ;;  %v147_v12 = vld [vmem:[#allocation8 + $0x2b8] sm:$0xff]  ;;  %v451_v15 = vpack.c.bf16 %v161_v6, %v157_v4  ;;  %v156_v16 = vld [vmem:[#allocation8 + $0x300] sm:$0xff] }
  0x47   :  { %496 = vmatprep.subr.bf16.mxu1 %v495_v43  ;;  %v160_v17 = vld [vmem:[#allocation8 + $0x320] sm:$0xff]  ;;  %v165_v18 = vld [vmem:[#allocation8 + $0x348] sm:$0xff]  ;;  %v505_v19 = vpack.c.bf16 %v138_v9, %v134_v8  ;;  %v507_v21 = vpack.c.bf16 %v147_v12, %v143_v11  ;;  %v146_v23 = vld [vmem:[#allocation8 + $0x2b0] sm:$0xff] }
  0x48   :  { %434 = vmatpush1.bf16.msra.mxu0 %v433_v22  ;;  %v169_v20 = vld [vmem:[#allocation8 + $0x368] sm:$0xff]  ;;  %v142_v22 = vld [vmem:[#allocation8 + $0x290] sm:$0xff]  ;;  %v155_v25 = vld [vmem:[#allocation8 + $0x2f8] sm:$0xff]  ;;  %v453_v26 = vpack.c.bf16 %v160_v17, %v156_v16 }
  0x49   :  { %436 = vmatprep.subr.bf16.mxu0 %v435_v24  ;;  %v698_v10 = vld [vmem:[#allocation2] sm:$0x3]  ;;  %v151_v24 = vld [vmem:[#allocation8 + $0x2d8] sm:$0xff]  ;;  %v455_v27 = vpack.c.bf16 %v169_v20, %v165_v18  ;;  %v164_v28 = vld [vmem:[#allocation8 + $0x340] sm:$0xff]  ;;  %v509_v31 = vpack.c.bf16 %v146_v23, %v142_v22 }
  0x4a   :  { %498 = vmatpush1.bf16.msra.mxu1 %v497_v56  ;;  %v197_v14 = vrot.slane %v698_v10, %v196_v0  ;;  %v168_v29 = vld [vmem:[#allocation8 + $0x360] sm:$0xff]  ;;  %v173_v30 = vld [vmem:[#allocation8 + $0x388] sm:$0xff]  ;;  %v511_v33 = vpack.c.bf16 %v155_v25, %v151_v24  ;;  %v150_v34 = vld [vmem:[#allocation8 + $0x2d0] sm:$0xff] }
  0x4b   :  { %500 = vmatprep.subr.bf16.mxu1 %v499_v58  ;;  %v177_v32 = vld [vmem:[#allocation8 + $0x3a8] sm:$0xff]  ;;  %v159_v36 = vld [vmem:[#allocation8 + $0x318] sm:$0xff]  ;;  %v457_v39 = vpack.c.bf16 %v168_v29, %v164_v28  ;;  %v172_v41 = vld [vmem:[#allocation8 + $0x380] sm:$0xff] }
  0x4c   :  { %438 = vmatpush1.bf16.msra.mxu0 %v437_v35  ;;  %285 = vmatprep.mubr.f32.mxu0 %v197_v14  ;;  %v154_v35 = vld [vmem:[#allocation8 + $0x2f0] sm:$0xff]  ;;  %v459_v40 = vpack.c.bf16 %v177_v32, %v173_v30  ;;  %v176_v42 = vld [vmem:[#allocation8 + $0x3a0] sm:$0xff]  ;;  %v181_v43 = vld [vmem:[#allocation8 + $0x3c8] sm:$0xff] }
  0x4d   :  { %440 = vmatprep.subr.bf16.mxu0 %v439_v38  ;;  %356 = vmatprep.mubr.f32.mxu1 %v197_v14  ;;  %v163_v38 = vld [vmem:[#allocation8 + $0x338] sm:$0xff]  ;;  %v513_v44 = vpack.c.bf16 %v154_v35, %v150_v34  ;;  %v185_v45 = vld [vmem:[#allocation8 + $0x3e8] sm:$0xff]  ;;  %v158_v47 = vld [vmem:[#allocation8 + $0x310] sm:$0xff] }
  0x4e   :  { %502 = vmatpush1.bf16.msra.mxu1 %v501_v5  ;;  %v515_v46 = vpack.c.bf16 %v163_v38, %v159_v36  ;;  %v162_v48 = vld [vmem:[#allocation8 + $0x330] sm:$0xff]  ;;  %v167_v49 = vld [vmem:[#allocation8 + $0x358] sm:$0xff]  ;;  %v463_v53 = vpack.c.bf16 %v185_v45, %v181_v43  ;;  %v180_v54 = vld [vmem:[#allocation8 + $0x3c0] sm:$0xff]  ;;  %v193_v5 = vrot.slane %v698_v10, %v192_v60 }
  0x4f   :  { %504 = vmatprep.subr.bf16.mxu1 %v503_v7  ;;  %v184_v55 = vld [vmem:[#allocation8 + $0x3e0] sm:$0xff]  ;;  %v517_v56 = vpack.c.bf16 %v162_v48, %v158_v47  ;;  %v166_v58 = vld [vmem:[#allocation8 + $0x350] sm:$0xff]  ;;  %v175_v61 = vld [vmem:[#allocation8 + $0x398] sm:$0xff] }
  0x50   :  { %442 = vmatpush1.bf16.msra.mxu0 %v441_v50  ;;  %v171_v50 = vld [vmem:[#allocation8 + $0x378] sm:$0xff]  ;;  %v170_v59 = vld [vmem:[#allocation8 + $0x370] sm:$0xff]  ;;  %v58_v38 = vld [vmem:[#allocation2 + $0x1] sm:$0x1] }
  0x51   :  { %444 = vmatprep.subr.bf16.mxu0 %v443_v52  ;;  %v461_v52 = vpack.c.bf16 %v176_v42, %v172_v41  ;;  %v519_v57 = vpack.c.bf16 %v171_v50, %v167_v49  ;;  %v179_v62 = vld [vmem:[#allocation8 + $0x3b8] sm:$0xff]  ;;  %v174_v3 = vld [vmem:[#allocation8 + $0x390] sm:$0xff] }
  0x52   :  { %506 = vmatpush1.bf16.msra.mxu1 %v505_v19  ;;  %v523_v2 = vpack.c.bf16 %v179_v62, %v175_v61  ;;  %v178_v4 = vld [vmem:[#allocation8 + $0x3b0] sm:$0xff]  ;;  %v183_v6 = vld [vmem:[#allocation8 + $0x3d8] sm:$0xff] }
  0x53   :  { %508 = vmatprep.subr.bf16.mxu1 %v507_v21  ;;  %v187_v7 = vld [vmem:[#allocation8 + $0x3f8] sm:$0xff]  ;;  %v525_v8 = vpack.c.bf16 %v178_v4, %v174_v3  ;;  %v182_v11 = vld [vmem:[#allocation8 + $0x3d0] sm:$0xff] }
  0x54   :  { %446 = vmatpush1.bf16.msra.mxu0 %v445_v63  ;;  %v465_v63 = vpack.c.bf16 %v184_v55, %v180_v54  ;;  %v527_v9 = vpack.c.bf16 %v187_v7, %v183_v6  ;;  %v186_v12 = vld [vmem:[#allocation8 + $0x3f0] sm:$0xff] }
  0x55   :  { %448 = vmatprep.subr.bf16.mxu0 %v447_v1  ;;  %v521_v1 = vpack.c.bf16 %v170_v59, %v166_v58  ;;  %v188_v14 = vld [vmem:[%s730_s4] sm:$0xf]  ;;  %s626_s4 = smov [#allocation10]  }
  0x56   :  { %510 = vmatpush1.bf16.msra.mxu1 %v509_v31  ;;  %v204_v10 = vrot.slane %v188_v14, %v192_v60  ;;  %v208_v16 = vrot.slane %v188_v14, %v196_v0  ;;  %s390_s24 = sshll.u32 %s626_s4, 4  ;;  %s391_s24 = int_to_ptr.vmem [resolvable:$true] %s390_s24 }
  0x57   :  { %512 = vmatprep.subr.bf16.mxu1 %v511_v33  ;;  %s592_s25 = scalar_lea.vmem %s391_s24, 16  ;;  %s596_s26 = scalar_lea.vmem %s391_s24, 32 }
  0x58   :  { %450 = vmatpush1.bf16.msra.mxu0 %v449_v13  ;;  %v529_v13 = vpack.c.bf16 %v186_v12, %v182_v11  ;;  %p593_p2 = scmp.ne.s32.totalorder %s391_s24, %s592_s25  ;;  %p597_p3 = scmp.lt.s32.totalorder %s391_s24, %s391_s24 }
  0x59   :  { %452 = vmatprep.subr.bf16.mxu0 %v451_v15  ;;  %p598_p4 = scmp.lt.s32.totalorder %s596_s26, %s592_s25 }
  0x5a   :  { %514 = vmatpush1.bf16.msra.mxu1 %v513_v44 }
  0x5b   :  { %516 = vmatprep.subr.bf16.mxu1 %v515_v46  ;;  %p599_p5 = por %p598_p4, %p597_p3 }
  0x5c   :  { %454 = vmatpush1.bf16.msra.mxu0 %v453_v26  ;;  %v215_v26 = vsub.s32 3, %v695_v51 }
  0x5d   :  { %456 = vmatprep.subr.bf16.mxu0 %v455_v27  ;;  %v211_v27 = vsub.s32 2, %v695_v51  ;;  %p600_p6 = pnand %p599_p5, %p593_p2 }
  0x5e   :  { %518 = vmatpush1.bf16.msra.mxu1 %v517_v56  ;;  %v216_v28 = vrot.slane %v188_v14, %v215_v26 }
  0x5f   :  { %520 = vmatprep.subr.bf16.mxu1 %v519_v57  ;;  %v212_v0 = vrot.slane %v188_v14, %v211_v27 }
  0x60   :  { %458 = vmatpush1.bf16.msra.mxu0 %v457_v39 }
  0x61   :  { %460 = vmatprep.subr.bf16.mxu0 %v459_v40 }
  0x62   :  { %522 = vmatpush1.bf16.msra.mxu1 %v521_v1 }
  0x63   :  { %524 = vmatprep.subr.bf16.mxu1 %v523_v2 }
  0x64   :  { %462 = vmatpush1.bf16.msra.mxu0 %v461_v52 }
  0x65   :  { %464 = vmatprep.subr.bf16.mxu0 %v463_v53 }
  0x66   :  { %526 = vmatpush1.bf16.msra.mxu1 %v525_v8 }
  0x67   :  { %528 = vmatprep.subr.bf16.mxu1 %v527_v9 }
  0x68   :  { %466 = vmatpush1.bf16.msra.mxu0 %v465_v63 }
  0x6a   :  { %530 = vmatpush1.bf16.msra.mxu1 %v529_v13 }
  0x6b   :  { %286 = vmatmul.mubr.f32.vlgmr.msra.gmra.mrb[0].mxu0 %v193_v5 }
  0x6d   :  { %357 = vmatmul.mubr.f32.vlgmr.msra.gmra.mrb[0].mxu1 %v193_v5 }
 0x13e   :  { %v287_v15 = vpop.f32.mrb[0].mxu0 }
 0x13f   :  { %v288_v17 = vadd.f32 %v287_v15, %v204_v10  ;;  %v289_v18 = vpop.f32.mrb[1].mxu0 }
 0x140   :  { %v290_v20 = vadd.f32 %v289_v18, %v208_v16  ;;  %v358_v22 = vpop.f32.mrb[0].mxu1 }
 0x141   :  { %v401_v19 = vmul.f32 -1.442695, %v288_v17  ;;  %v360_v23 = vpop.f32.mrb[1].mxu1  ;;  %v359_v33 = vadd.f32 %v358_v22, %v212_v0 }
 0x142   :  { %v402_v21 = vmul.f32 -1.442695, %v290_v20  ;;  %v361_v31 = vadd.f32 %v360_v23, %v216_v28 }
 0x143   :  { %538 = vpow2.f32 %v401_v19 }
 0x144   :  { %540 = vpow2.f32 %v402_v21 }
 0x14d   :  { %v539_v24 = vpop.eup %538 }
 0x14e   :  { %v366_v25 = vadd.f32 1.0, %v539_v24  ;;  %v541_v29 = vpop.eup %540 }
 0x14f   :  { %v372_v30 = vadd.f32 1.0, %v541_v29 }
 0x150   :  { %542 = vrcp.f32 %v366_v25 }
 0x151   :  { %544 = vrcp.f32 %v372_v30 }
 0x15a   :  { %v543_v32 = vpop.eup %542 }
 0x15b   :  { %v375_v34 = vmul.f32 %v543_v32, %v361_v31  ;;  %v545_v36 = vpop.eup %544 }
 0x15c   :  { %v378_v39 = vsub.f32 1.0, %v545_v36  ;;  %v380_v42 = vmul.f32 %v545_v36, %v58_v38 }
 0x15d   :  { %v376_v35 = vadd.f32 %v375_v34, %v359_v33 }
 0x15f   :  { %546 = vtanh.f32 %v376_v35 }
 0x169   :  { %v547_v40 = vpop.eup %546 }
 0x16a   :  { %v379_v41 = vmul.f32 %v547_v40, %v378_v39 }
 0x16c   :  { %v381_v51 = vadd.f32 %v380_v42, %v379_v41 }
 0x16e   :  { %382 = vst.msk [vmem:[#allocation2 + $0x1] sm:$0x1] %vm681_vm0, %v381_v51  ;;  %383 = vst [vmem:[#allocation10] sm:$0x1] %v381_v51 }
 0x16f   :  { %603 = shalt.err (!%p600_p6)
}
 0x170   :  { %s604_s29 = scalar_lea.hbm %s731_s5, 16 }
 0x171   :  { %p605_p7 = scmp.ne.s32.totalorder %s731_s5, %s604_s29  ;;  %p608_p8 = scmp.lt.u32.totalorder %s604_s29, %s731_s5 }
 0x173   :  { %p610_p9 = pnand %p608_p8, %p605_p7 }
 0x175   :  { %613 = shalt.err (!%p610_p9)
}
 0x176   :  { %393 = dma.vmem_to_hbm [thread:$0]  %s391_s24, 16, %s731_s5, [#allocation7]  }
 0x177   :  { %618 = dma.done.wait [#allocation7], 16  }
 0x178   :  { %619 = vsyncadd [#allocation7], 4294967280 }
 0x179   :  { %397 = vsyncpa [#allocation6], 1 }
 0x17a   :  { %398 = vsyncpa [#allocation9], 1 }
 0x17b   :  { %399 = vsyncpa [#allocation7], 1 }

</bundles_post_ra>
